<compile_context>
chip_gen: v7x
topology: tpu7x:2x2x1
jax: 0.10.0
libtpu: 0.0.40
codegen_flags: <defaults>
</compile_context>

<pallas_src>
import jax
import jax.numpy as jnp
import numpy as np
from jax.experimental import pallas as pl
from jax.experimental.pallas import tpu as pltpu


def make_residual_kernel(W, B_TILE):
    """Kernel factory.  W = image width (needed for tap linear offsets)."""

    def kernel(x_ref, mask_ref, w1_ref, b1_ref, w2_ref, b2_ref, out_ref):
        # Per grid step (B_TILE images), spatial-on-lanes layout:
        #   x_ref, out_ref : (B_TILE, Cin, HWp) bf16   HWp on the 128-lane axis
        #   mask_ref       : (9, 1, HWp)       f32     precomputed border masks
        #   w1_ref         : (Coutp, Cin)      bf16    1x1 conv, BN scale folded
        #   b1_ref         : (Coutp, 1)        f32     folded BN bias
        #   w2_ref         : (Cin, 9*Coutp)    bf16    3x3 conv (dy,dx,cout), BN folded
        #   b2_ref         : (Cin, 1)          f32     folded BN bias
        masks = mask_ref[...]          # (9, 1, HWp) f32, loaded once per step
        w1 = w1_ref[...]
        b1 = b1_ref[...]
        w2 = w2_ref[...]
        b2 = b2_ref[...]
        HWp = x_ref.shape[-1]

        for b in range(B_TILE):
            xb = x_ref[b]                                   # (Cin, HWp) bf16

            # ---- conv1 (1x1) + BN + LeakyReLU(0.1): one channel matmul ----
            y1 = jnp.dot(w1, xb, preferred_element_type=jnp.float32)
            y1 = y1 + b1
            y1 = jnp.where(y1 > 0, y1, 0.1 * y1)            # padded rows stay 0

            # ---- conv2 (3x3, pad=1) as ONE (Cin, 9*Coutp) @ (9*Coutp, HWp) matmul
            # Spatial shifts = lane rolls (XLU); zero padding = precomputed masks.
            taps = []
            t_i = 0
            for oy in (-1, 0, 1):
                for ox in (-1, 0, 1):
                    off = oy * W + ox
                    t = y1 if off == 0 else pltpu.roll(y1, shift=(-off) % HWp, axis=1)
                    t = t * masks[t_i]                      # f32 mask multiply
                    taps.append(t.astype(jnp.bfloat16))     # bf16 MXU operand
                    t_i += 1
            s = jnp.concatenate(taps, axis=0)               # (9*Coutp, HWp) bf16, tile-aligned
            y2 = jnp.dot(w2, s, preferred_element_type=jnp.float32)
            y2 = y2 + b2
            y2 = jnp.where(y2 > 0, y2, 0.1 * y2)

            # ---- residual add; lane-dense (multiple-of-128) bf16 store ----
            out_ref[b] = (y2 + xb.astype(jnp.float32)).astype(out_ref.dtype)

    return kernel


def _make_tap_masks(H, W, HWp):
    """(9, 1, HWp) f32 validity masks per 3x3 tap; pad lanes (>= H*W) are 0."""
    HW = H * W
    l = np.arange(HWp)
    h = l // W
    w = l % W
    in_img = l < HW
    ms = []
    for oy in (-1, 0, 1):
        for ox in (-1, 0, 1):
            m = in_img.copy()
            if oy == -1:
                m = m & (h >= 1)
            elif oy == 1:
                m = m & (h <= H - 2)
            if ox == -1:
                m = m & (w >= 1)
            elif ox == 1:
                m = m & (w <= W - 2)
            ms.append(m)
    return jnp.asarray(np.stack(ms).astype(np.float32).reshape(9, 1, HWp))


def _choose_batch_tile(n, per_image_bytes, budget_bytes=8 << 20):
    """Largest divisor of n fitting the per-step budget, keeping >=2 grid steps."""
    best = 1
    for d in range(1, n + 1):
        if n % d:
            continue
        if d * per_image_bytes > budget_bytes:
            continue
        if n >= 2 and n // d < 2:      # keep >=2 parallel steps for v7x's 2 TCs
            continue
        best = d
    return best


def residual_block(x_nchw, packed):
    """x_nchw: (N, Cin, H, W); packed: output of pack_params(). Returns bf16."""
    N, Cin, H, W = x_nchw.shape
    HW = H * W
    HWp = ((HW + 127) // 128) * 128                 # lane-dense padding
    Coutp = packed["w1s"].shape[0]

    x = x_nchw.reshape(N, Cin, HW).astype(jnp.bfloat16)   # bf16 I/O, no transpose
    if HWp != HW:
        x = jnp.pad(x, ((0, 0), (0, 0), (0, HWp - HW)))

    masks = _make_tap_masks(H, W, HWp)

    # Rough per-image working set: in/out blocks (bf16, double-buffered) +
    # y1 (f32) + bf16 tap stack + y2 (f32).
    per_image = HWp * (4 * Cin * 2 + Coutp * 4 + 9 * Coutp * 2 + Cin * 4)
    B_TILE = _choose_batch_tile(N, per_image)
    grid = (N // B_TILE,)

    out = pl.pallas_call(
        make_residual_kernel(W, B_TILE),
        out_shape=jax.ShapeDtypeStruct((N, Cin, HWp), jnp.bfloat16),
        grid_spec=pltpu.PrefetchScalarGridSpec(
            num_scalar_prefetch=0,
            grid=grid,
            in_specs=[
                pl.BlockSpec((B_TILE, Cin, HWp), lambda b: (b, 0, 0)),
                pl.BlockSpec((9, 1, HWp), lambda b: (0, 0, 0)),      # masks, resident
                pl.BlockSpec((Coutp, Cin), lambda b: (0, 0)),        # weights, resident
                pl.BlockSpec((Coutp, 1), lambda b: (0, 0)),
                pl.BlockSpec((Cin, 9 * Coutp), lambda b: (0, 0)),
                pl.BlockSpec((Cin, 1), lambda b: (0, 0)),
            ],
            out_specs=pl.BlockSpec((B_TILE, Cin, HWp), lambda b: (b, 0, 0)),
        ),
        # Independent batch blocks: let the grid shard across TensorCores.
        compiler_params=pltpu.CompilerParams(
            dimension_semantics=("parallel",),
            vmem_limit_bytes=32 * 1024 * 1024,
        ),
    )(x, masks, packed["w1s"], packed["b1"], packed["w2s"], packed["b2"])

    if HWp != HW:
        out = out[:, :, :HW]
    return out.reshape(N, Cin, H, W)


def pack_params(p):
    """Fold BN scale into conv weights; bf16 matmul operands, f32 biases."""
    Cout, Cin = p["w1"].shape
    Coutp = ((Cout + 15) // 16) * 16   # pad to bf16 sublane-packing tile (16 rows)

    w1s = p["w1"] * p["s1"][:, None]                                  # (Cout, Cin)
    w1s = jnp.pad(w1s, ((0, Coutp - Cout), (0, 0))).astype(jnp.bfloat16)
    b1 = jnp.pad(p["b1"], (0, Coutp - Cout)).reshape(Coutp, 1).astype(jnp.float32)

    # OIHW (Cin, Cout, 3, 3) -> (Cin, 3, 3, Coutp) -> (Cin, 9*Coutp);
    # column order (dy, dx, cout) matches the kernel's tap stacking order.
    w2 = jnp.transpose(p["w2_oihw"], (0, 2, 3, 1))
    w2 = jnp.pad(w2, ((0, 0), (0, 0), (0, 0), (0, Coutp - Cout)))
    w2s = (w2.reshape(Cin, 9 * Coutp) * p["s2"][:, None]).astype(jnp.bfloat16)
    b2 = p["b2"].reshape(Cin, 1).astype(jnp.float32)

    return {"w1s": w1s, "b1": b1, "w2s": w2s, "b2": b2}


def make_params(key, in_channels, out_channels):
    """Deterministic synthetic raw parameters (BN in inference mode)."""
    Cin, Cout = in_channels, out_channels
    ks = jax.random.split(key, 10)
    eps = 1e-5

    w1 = jax.random.normal(ks[0], (Cout, Cin), jnp.float32) * 0.2         # 1x1, OI
    w2 = jax.random.normal(ks[1], (Cin, Cout, 3, 3), jnp.float32) * 0.2   # 3x3, OIHW

    g1 = jax.random.uniform(ks[2], (Cout,), minval=0.5, maxval=1.5)
    be1 = jax.random.normal(ks[3], (Cout,)) * 0.1
    m1 = jax.random.normal(ks[4], (Cout,)) * 0.1
    v1 = jax.random.uniform(ks[5], (Cout,), minval=0.5, maxval=1.5)
    s1 = g1 / jnp.sqrt(v1 + eps)
    b1 = be1 - m1 * s1

    g2 = jax.random.uniform(ks[6], (Cin,), minval=0.5, maxval=1.5)
    be2 = jax.random.normal(ks[7], (Cin,)) * 0.1
    m2 = jax.random.normal(ks[8], (Cin,)) * 0.1
    v2 = jax.random.uniform(ks[9], (Cin,), minval=0.5, maxval=1.5)
    s2 = g2 / jnp.sqrt(v2 + eps)
    b2 = be2 - m2 * s2

    return {"w1": w1, "w2_oihw": w2, "s1": s1, "b1": b1, "s2": s2, "b2": b2}


def reference_nchw(x, p):
    """Plain-JAX f32 reference in NCHW using the raw (unpacked) parameters."""
    Cout, Cin = p["w1"].shape
    y = jax.lax.conv_general_dilated(
        x, p["w1"][:, :, None, None], (1, 1), [(0, 0), (0, 0)],
        dimension_numbers=("NCHW", "OIHW", "NCHW"))
    y = y * p["s1"].reshape(1, Cout, 1, 1) + p["b1"].reshape(1, Cout, 1, 1)
    y = jnp.where(y > 0, y, 0.1 * y)
    y = jax.lax.conv_general_dilated(
        y, p["w2_oihw"], (1, 1), [(1, 1), (1, 1)],
        dimension_numbers=("NCHW", "OIHW", "NCHW"))
    y = y * p["s2"].reshape(1, Cin, 1, 1) + p["b2"].reshape(1, Cin, 1, 1)
    y = jnp.where(y > 0, y, 0.1 * y)
    return y + x


if __name__ == "__main__":
    N, Cin, Cout, H, W = 2, 8, 4, 16, 16   # ResidualBlock(in_channels=8, out_channels=4)

    key = jax.random.PRNGKey(0)
    k_x, k_p = jax.random.split(key)
    x = jax.random.normal(k_x, (N, Cin, H, W), jnp.float32)
    # Quantize the input to bf16 once so kernel and reference see the same values.
    x = x.astype(jnp.bfloat16).astype(jnp.float32)

    raw = make_params(k_p, Cin, Cout)
    packed = pack_params(raw)

    out = residual_block(x, packed)
    out = jax.block_until_ready(out)

    ref = reference_nchw(x, raw)
    # bf16 activations/weights in the kernel vs f32 reference -> bf16-level tolerance.
    np.testing.assert_allclose(np.asarray(out.astype(jnp.float32)), np.asarray(ref),
                               rtol=5e-2, atol=5e-2)

    print("KERNEL_OK")
</pallas_src>

<mosaic_0001>
module attributes {stable_mosaic.version = 11 : i64} {
  func.func @kernel(%arg0: i32, %arg1: memref<1x8x256xbf16, #tpu.memory_space<vmem>>, %arg2: memref<9x1x256xf32, #tpu.memory_space<vmem>>, %arg3: memref<16x8xbf16, #tpu.memory_space<vmem>>, %arg4: memref<16x1xf32, #tpu.memory_space<vmem>>, %arg5: memref<8x144xbf16, #tpu.memory_space<vmem>>, %arg6: memref<8x1xf32, #tpu.memory_space<vmem>>, %arg7: memref<1x8x256xbf16, #tpu.memory_space<vmem>>) attributes {dimension_semantics = [#tpu.dimension_semantics<parallel>], iteration_bounds = array<i64: 2>, scalar_prefetch = 0 : i64, scratch_operands = 0 : i64, tpu.core_type = #tpu.core_type<tc>, window_params = [{transform_indices = @transform_0, window_bounds = array<i64: 1, 8, 256>}, {pipeline_mode = #tpu.pipeline_mode<synchronous>, transform_indices = @transform_1, window_bounds = array<i64: 9, 1, 256>}, {pipeline_mode = #tpu.pipeline_mode<synchronous>, transform_indices = @transform_2, window_bounds = array<i64: 16, 8>}, {pipeline_mode = #tpu.pipeline_mode<synchronous>, transform_indices = @transform_3, window_bounds = array<i64: 16, 1>}, {pipeline_mode = #tpu.pipeline_mode<synchronous>, transform_indices = @transform_4, window_bounds = array<i64: 8, 144>}, {pipeline_mode = #tpu.pipeline_mode<synchronous>, transform_indices = @transform_5, window_bounds = array<i64: 8, 1>}, {transform_indices = @transform_6, window_bounds = array<i64: 1, 8, 256>}]} {
    %c0 = arith.constant 0 : index
    %c0_0 = arith.constant 0 : index
    %c0_1 = arith.constant 0 : index
    %0 = vector.load %arg2[%c0, %c0_0, %c0_1] : memref<9x1x256xf32, #tpu.memory_space<vmem>>, vector<9x1x256xf32>
    %c0_2 = arith.constant 0 : index
    %c0_3 = arith.constant 0 : index
    %1 = vector.load %arg3[%c0_2, %c0_3] : memref<16x8xbf16, #tpu.memory_space<vmem>>, vector<16x8xbf16>
    %c0_4 = arith.constant 0 : index
    %c0_5 = arith.constant 0 : index
    %2 = vector.load %arg4[%c0_4, %c0_5] : memref<16x1xf32, #tpu.memory_space<vmem>>, vector<16x1xf32>
    %c0_6 = arith.constant 0 : index
    %c0_7 = arith.constant 0 : index
    %3 = vector.load %arg5[%c0_6, %c0_7] : memref<8x144xbf16, #tpu.memory_space<vmem>>, vector<8x144xbf16>
    %c0_8 = arith.constant 0 : index
    %c0_9 = arith.constant 0 : index
    %4 = vector.load %arg6[%c0_8, %c0_9] : memref<8x1xf32, #tpu.memory_space<vmem>>, vector<8x1xf32>
    %c0_10 = arith.constant 0 : index
    %c0_11 = arith.constant 0 : index
    %c0_12 = arith.constant 0 : index
    %5 = vector.load %arg1[%c0_10, %c0_11, %c0_12] : memref<1x8x256xbf16, #tpu.memory_space<vmem>>, vector<1x8x256xbf16>
    %6 = vector.shape_cast %5 : vector<1x8x256xbf16> to vector<8x256xbf16>
    %cst = arith.constant dense<0.000000e+00> : vector<16x256xf32>
    %7 = tpu.matmul %1, %6, %cst {dimension_numbers = #tpu.dot_dimension_numbers<[1], [0], [0], [1], [0, 0, 1, 1], [], []>} : vector<16x8xbf16>, vector<8x256xbf16>, vector<16x256xf32> -> vector<16x256xf32>
    %8 = vector.broadcast %2 : vector<16x1xf32> to vector<16x256xf32>
    %9 = arith.addf %7, %8 : vector<16x256xf32>
    %cst_13 = arith.constant 0.000000e+00 : f32
    %10 = vector.broadcast %cst_13 : f32 to vector<16x256xf32>
    %11 = arith.cmpf ogt, %9, %10 : vector<16x256xf32>
    %cst_14 = arith.constant 1.000000e-01 : f32
    %12 = vector.broadcast %cst_14 : f32 to vector<16x256xf32>
    %13 = arith.mulf %12, %9 : vector<16x256xf32>
    %14 = arith.select %11, %9, %13 : vector<16x256xi1>, vector<16x256xf32>
    %c17_i32 = arith.constant 17 : i32
    %15 = tpu.dynamic_rotate %14 by %c17_i32 dim 1 : vector<16x256xf32>, i32 -> vector<16x256xf32>
    %16 = vector.extract_strided_slice %0 {offsets = [0, 0, 0], sizes = [1, 1, 256], strides = [1, 1, 1]} : vector<9x1x256xf32> to vector<1x1x256xf32>
    %17 = vector.shape_cast %16 : vector<1x1x256xf32> to vector<1x256xf32>
    %18 = vector.broadcast %17 : vector<1x256xf32> to vector<16x256xf32>
    %19 = arith.mulf %15, %18 : vector<16x256xf32>
    %20 = arith.truncf %19 : vector<16x256xf32> to vector<16x256xbf16>
    %c16_i32 = arith.constant 16 : i32
    %21 = tpu.dynamic_rotate %14 by %c16_i32 dim 1 : vector<16x256xf32>, i32 -> vector<16x256xf32>
    %22 = vector.extract_strided_slice %0 {offsets = [1, 0, 0], sizes = [1, 1, 256], strides = [1, 1, 1]} : vector<9x1x256xf32> to vector<1x1x256xf32>
    %23 = vector.shape_cast %22 : vector<1x1x256xf32> to vector<1x256xf32>
    %24 = vector.broadcast %23 : vector<1x256xf32> to vector<16x256xf32>
    %25 = arith.mulf %21, %24 : vector<16x256xf32>
    %26 = arith.truncf %25 : vector<16x256xf32> to vector<16x256xbf16>
    %c15_i32 = arith.constant 15 : i32
    %27 = tpu.dynamic_rotate %14 by %c15_i32 dim 1 : vector<16x256xf32>, i32 -> vector<16x256xf32>
    %28 = vector.extract_strided_slice %0 {offsets = [2, 0, 0], sizes = [1, 1, 256], strides = [1, 1, 1]} : vector<9x1x256xf32> to vector<1x1x256xf32>
    %29 = vector.shape_cast %28 : vector<1x1x256xf32> to vector<1x256xf32>
    %30 = vector.broadcast %29 : vector<1x256xf32> to vector<16x256xf32>
    %31 = arith.mulf %27, %30 : vector<16x256xf32>
    %32 = arith.truncf %31 : vector<16x256xf32> to vector<16x256xbf16>
    %c1_i32 = arith.constant 1 : i32
    %33 = tpu.dynamic_rotate %14 by %c1_i32 dim 1 : vector<16x256xf32>, i32 -> vector<16x256xf32>
    %34 = vector.extract_strided_slice %0 {offsets = [3, 0, 0], sizes = [1, 1, 256], strides = [1, 1, 1]} : vector<9x1x256xf32> to vector<1x1x256xf32>
    %35 = vector.shape_cast %34 : vector<1x1x256xf32> to vector<1x256xf32>
    %36 = vector.broadcast %35 : vector<1x256xf32> to vector<16x256xf32>
    %37 = arith.mulf %33, %36 : vector<16x256xf32>
    %38 = arith.truncf %37 : vector<16x256xf32> to vector<16x256xbf16>
    %39 = vector.extract_strided_slice %0 {offsets = [4, 0, 0], sizes = [1, 1, 256], strides = [1, 1, 1]} : vector<9x1x256xf32> to vector<1x1x256xf32>
    %40 = vector.shape_cast %39 : vector<1x1x256xf32> to vector<1x256xf32>
    %41 = vector.broadcast %40 : vector<1x256xf32> to vector<16x256xf32>
    %42 = arith.mulf %14, %41 : vector<16x256xf32>
    %43 = arith.truncf %42 : vector<16x256xf32> to vector<16x256xbf16>
    %c255_i32 = arith.constant 255 : i32
    %44 = tpu.dynamic_rotate %14 by %c255_i32 dim 1 : vector<16x256xf32>, i32 -> vector<16x256xf32>
    %45 = vector.extract_strided_slice %0 {offsets = [5, 0, 0], sizes = [1, 1, 256], strides = [1, 1, 1]} : vector<9x1x256xf32> to vector<1x1x256xf32>
    %46 = vector.shape_cast %45 : vector<1x1x256xf32> to vector<1x256xf32>
    %47 = vector.broadcast %46 : vector<1x256xf32> to vector<16x256xf32>
    %48 = arith.mulf %44, %47 : vector<16x256xf32>
    %49 = arith.truncf %48 : vector<16x256xf32> to vector<16x256xbf16>
    %c241_i32 = arith.constant 241 : i32
    %50 = tpu.dynamic_rotate %14 by %c241_i32 dim 1 : vector<16x256xf32>, i32 -> vector<16x256xf32>
    %51 = vector.extract_strided_slice %0 {offsets = [6, 0, 0], sizes = [1, 1, 256], strides = [1, 1, 1]} : vector<9x1x256xf32> to vector<1x1x256xf32>
    %52 = vector.shape_cast %51 : vector<1x1x256xf32> to vector<1x256xf32>
    %53 = vector.broadcast %52 : vector<1x256xf32> to vector<16x256xf32>
    %54 = arith.mulf %50, %53 : vector<16x256xf32>
    %55 = arith.truncf %54 : vector<16x256xf32> to vector<16x256xbf16>
    %c240_i32 = arith.constant 240 : i32
    %56 = tpu.dynamic_rotate %14 by %c240_i32 dim 1 : vector<16x256xf32>, i32 -> vector<16x256xf32>
    %57 = vector.extract_strided_slice %0 {offsets = [7, 0, 0], sizes = [1, 1, 256], strides = [1, 1, 1]} : vector<9x1x256xf32> to vector<1x1x256xf32>
    %58 = vector.shape_cast %57 : vector<1x1x256xf32> to vector<1x256xf32>
    %59 = vector.broadcast %58 : vector<1x256xf32> to vector<16x256xf32>
    %60 = arith.mulf %56, %59 : vector<16x256xf32>
    %61 = arith.truncf %60 : vector<16x256xf32> to vector<16x256xbf16>
    %c239_i32 = arith.constant 239 : i32
    %62 = tpu.dynamic_rotate %14 by %c239_i32 dim 1 : vector<16x256xf32>, i32 -> vector<16x256xf32>
    %63 = vector.extract_strided_slice %0 {offsets = [8, 0, 0], sizes = [1, 1, 256], strides = [1, 1, 1]} : vector<9x1x256xf32> to vector<1x1x256xf32>
    %64 = vector.shape_cast %63 : vector<1x1x256xf32> to vector<1x256xf32>
    %65 = vector.broadcast %64 : vector<1x256xf32> to vector<16x256xf32>
    %66 = arith.mulf %62, %65 : vector<16x256xf32>
    %67 = arith.truncf %66 : vector<16x256xf32> to vector<16x256xbf16>
    %68 = tpu.concatenate %20, %26, %32, %38, %43, %49, %55, %61, %67 in 0 : vector<16x256xbf16>, vector<16x256xbf16>, vector<16x256xbf16>, vector<16x256xbf16>, vector<16x256xbf16>, vector<16x256xbf16>, vector<16x256xbf16>, vector<16x256xbf16>, vector<16x256xbf16> -> vector<144x256xbf16>
    %cst_15 = arith.constant dense<0.000000e+00> : vector<8x256xf32>
    %69 = tpu.matmul %3, %68, %cst_15 {dimension_numbers = #tpu.dot_dimension_numbers<[1], [0], [0], [1], [0, 0, 1, 1], [], []>} : vector<8x144xbf16>, vector<144x256xbf16>, vector<8x256xf32> -> vector<8x256xf32>
    %70 = vector.broadcast %4 : vector<8x1xf32> to vector<8x256xf32>
    %71 = arith.addf %69, %70 : vector<8x256xf32>
    %cst_16 = arith.constant 0.000000e+00 : f32
    %72 = vector.broadcast %cst_16 : f32 to vector<8x256xf32>
    %73 = arith.cmpf ogt, %71, %72 : vector<8x256xf32>
    %cst_17 = arith.constant 1.000000e-01 : f32
    %74 = vector.broadcast %cst_17 : f32 to vector<8x256xf32>
    %75 = arith.mulf %74, %71 : vector<8x256xf32>
    %76 = arith.select %73, %71, %75 : vector<8x256xi1>, vector<8x256xf32>
    %77 = arith.extf %6 : vector<8x256xbf16> to vector<8x256xf32>
    %78 = arith.addf %76, %77 : vector<8x256xf32>
    %79 = arith.truncf %78 : vector<8x256xf32> to vector<8x256xbf16>
    %c0_18 = arith.constant 0 : index
    %c0_19 = arith.constant 0 : index
    %c0_20 = arith.constant 0 : index
    %80 = vector.load %arg7[%c0_18, %c0_19, %c0_20] : memref<1x8x256xbf16, #tpu.memory_space<vmem>>, vector<1x8x256xbf16>
    %81 = vector.shape_cast %80 : vector<1x8x256xbf16> to vector<8x256xbf16>
    %82 = vector.shape_cast %79 : vector<8x256xbf16> to vector<1x8x256xbf16>
    tpu.vector_store %arg7[%c0_18, %c0_19, %c0_20], %82 {strides = array<i32>} : memref<1x8x256xbf16, #tpu.memory_space<vmem>>, vector<1x8x256xbf16>,
    return
  }
  func.func @transform_0(%arg0: i32) -> (i32, i32, i32) {
    %c0_i32 = arith.constant 0 : i32
    %c0_i32_0 = arith.constant 0 : i32
    %c0_i32_1 = arith.constant 0 : i32
    return %arg0, %c0_i32, %c0_i32_0 : i32, i32, i32
  }
  func.func @transform_1(%arg0: i32) -> (i32, i32, i32) {
    %c0_i32 = arith.constant 0 : i32
    %c0_i32_0 = arith.constant 0 : i32
    %c0_i32_1 = arith.constant 0 : i32
    %c0_i32_2 = arith.constant 0 : i32
    return %c0_i32, %c0_i32_0, %c0_i32_1 : i32, i32, i32
  }
  func.func @transform_2(%arg0: i32) -> (i32, i32) {
    %c0_i32 = arith.constant 0 : i32
    %c0_i32_0 = arith.constant 0 : i32
    %c0_i32_1 = arith.constant 0 : i32
    return %c0_i32, %c0_i32_0 : i32, i32
  }
  func.func @transform_3(%arg0: i32) -> (i32, i32) {
    %c0_i32 = arith.constant 0 : i32
    %c0_i32_0 = arith.constant 0 : i32
    %c0_i32_1 = arith.constant 0 : i32
    return %c0_i32, %c0_i32_0 : i32, i32
  }
  func.func @transform_4(%arg0: i32) -> (i32, i32) {
    %c0_i32 = arith.constant 0 : i32
    %c0_i32_0 = arith.constant 0 : i32
    %c0_i32_1 = arith.constant 0 : i32
    return %c0_i32, %c0_i32_0 : i32, i32
  }
  func.func @transform_5(%arg0: i32) -> (i32, i32) {
    %c0_i32 = arith.constant 0 : i32
    %c0_i32_0 = arith.constant 0 : i32
    %c0_i32_1 = arith.constant 0 : i32
    return %c0_i32, %c0_i32_0 : i32, i32
  }
  func.func @transform_6(%arg0: i32) -> (i32, i32, i32) {
    %c0_i32 = arith.constant 0 : i32
    %c0_i32_0 = arith.constant 0 : i32
    %c0_i32_1 = arith.constant 0 : i32
    return %arg0, %c0_i32, %c0_i32_0 : i32, i32, i32
  }
}

</mosaic_0001>

<bundles_post_ra>
// kernel: tpu_custom_call.1
= control target key start
LH: loop header
LB: loop body
LE: loop exit
PB: predicated region body
PF: predicated region fallthrough
CT: control target
= control target key end

     0   :  { %11 = vsyncpa [#allocation3], 0  ;;  %s1260_s0 = inlined_call_operand.vmem [shape: bf16[2,8,256], index: 0, kind: input, shape index: {}]   ;;  %s1261_s1 = inlined_call_operand.vmem [shape: f32[9,1,256], index: 1, kind: input, shape index: {}]   ;;  %s1262_s2 = inlined_call_operand.vmem [shape: bf16[16,8], index: 2, kind: input, shape index: {}]   ;;  %s1263_s3 = inlined_call_operand.vmem [shape: f32[16,1], index: 3, kind: input, shape index: {}]   ;;  %s1264_s4 = inlined_call_operand.vmem [shape: bf16[8,144], index: 4, kind: input, shape index: {}]   ;;  %s1265_s5 = inlined_call_operand.vmem [shape: f32[8,1], index: 5, kind: input, shape index: {}]   ;;  %s1266_s6 = inlined_call_operand.hbm [shape: bf16[2,8,256], index: 6, kind: output, shape index: {}]  }
   0x1   :  { %13 = vsyncpa [#allocation3 + $0x1], 0  ;;  %s948_s21 = smov 0   ;;  %s950_s22 = smov 0  }
   0x2   :  { %s952_s23 = smov 0   ;;  %s954_s24 = smov 0  }
   0x3 LB: > { %s969_s25 = sadd.s32 4294967295, %s901_s24   ;;  %s761_s26 = sadd.s32 4294967294, %s901_s24   ;;  %s901_s24 = sphi %s954_s24, %s1272_s24   ;;  %s897_s23 = sphi %s952_s23, %s1271_s23   ;;  %s893_s22 = sphi %s950_s22, %s1270_s22   ;;  %s889_s21 = sphi %s948_s21, %s1269_s21  }
   0x4   : > { %s973_s27 = sadd.s32 1, %s901_s24   ;;  %s157_s28 = sadd.s32 1, %s897_s23 }
   0x5   : > { %s154_s29 = ssub.s32 %s901_s24, %s973_s27  ;;  %p167_p0 = scmp.ne.s32.totalorder %s897_s23, %s893_s22 }
   0x6   : > { %p155_p1 = scmp.eq.s32.totalorder %s154_s29, 0  ;;  %p168_p2 = scmp.eq.s32.totalorder %s969_s25, 1 }
   0x7   : > { %p173_p3 = scmp.ne.s32.totalorder %s893_s22, %s889_s21  ;;  %p174_p4 = scmp.eq.s32.totalorder %s761_s26, 1 }
   0x8   : > { %s984_s30 = scalar_select %p155_p1, %s897_s23, %s157_s28  }
   0x9   : > { %p986_p5 = por %p168_p2, %p167_p0  ;;  %p990_p6 = por %p174_p4, %p173_p3 }
   0xa   : > { %p764_p7 = scmp.ge.s32.totalorder %s901_s24, 1  ;;  %p215_p8 = scmp.lt.s32.totalorder %s901_s24, 3 }
   0xc   : > { %p216_p9 = pnand %p764_p7, %p215_p8 }
   0xd   : > { %p245_p10 = scmp.lt.s32.totalorder (!%p216_p9), %s969_s25, 1  ;;  %v903_v0 = vmov (!%p216_p9), 0   ;;  %v262_v1 = vld [vmem:[%s1263_s3] sm:$0xff] (!%p216_p9)  ;;  %v263_v2 = vld [vmem:[%s1263_s3 + $0x8] sm:$0xff] (!%p216_p9)  ;;  %vm291_vm0 = vcmask (!%p216_p9), 1043456   ;;  %vm287_vm1 = vcmask (!%p216_p9), 64512   ;;  %v361_v8 = vlaneseq (!%p216_p9) }
   0xe   : > { %219 = sbr.rel (%p216_p9) target bundleno = 673 (0x2a1), region = 44  ;;  %330 = vmatprep.mubr.bf16.mxu0 (!%p216_p9), %v903_v0  ;;  %833 = vset.pattern.permute.xlu0 (!%p216_p9), %v903_v0  ;;  %v836_v7 = vld [vmem:[%s1262_s2] sm:$0xff] (!%p216_p9)   ;;  %v255_v16 = vld [vmem:[%s1261_s1 + $0x8] sm:$0x3] (!%p216_p9)  ;;  %s904_s28 = smov (!%p216_p9), 16   ;;  %vm623_vm6 = vcmask (!%p216_p9), 130048  }
   0xf   : > { %269 = vperm.xlu0 (!%p216_p9), %833, %v262_v1   ;;  %v370_v10 = vshrl.u32 (!%p216_p9), %v361_v8, 7  ;;  %s905_s29 = smov (!%p216_p9), 17   ;;  %s906_s9 = smov (!%p216_p9), 15   ;;  %v1049_v39 = vld [vmem:[%s1264_s4] sm:$0xff] (!%p216_p9)  ;;  %v1069_v54 = vand.u32 (!%p216_p9), 127, %v361_v8 }
  0x10   : > { %s907_s10 = smov (!%p216_p9), 1   ;;  %s909_s12 = smov (!%p216_p9), 113   ;;  %v265_v40 = vld [vmem:[%s1265_s5] sm:$0xff] (!%p216_p9)  ;;  %v774_v41 = vcombine.high (!%p216_p9), %v1049_v39, %v1049_v39 }
  0x11   : > { %v1017_v12 = vsub.s32 (!%p216_p9), 0, %v370_v10  ;;  %v1019_v15 = vsub.s32 (!%p216_p9), 1, %v370_v10  ;;  %s910_s13 = smov (!%p216_p9), 112   ;;  %v251_v57 = vld [vmem:[%s1261_s1] sm:$0x3] (!%p216_p9)  ;;  %vm363_vm7 = vcmp.lt.s32.totalorder (!%p216_p9), %v1069_v54, 17 }
  0x12   : > { %775 = vmatprep.mubr.msk.bf16.mxu1 (!%p216_p9), %vm623_vm6, %v774_v41  ;;  %v252_v61 = vld [vmem:[%s1261_s1 + $0x2] sm:$0x3] (!%p216_p9)  ;;  %vm393_vm8 = vcmp.lt.s32.totalorder (!%p216_p9), %v1069_v54, 16  ;;  %vm423_vm9 = vcmp.lt.s32.totalorder (!%p216_p9), %v1069_v54, 15  ;;  %vm453_vm10 = vcmp.lt.s32.totalorder (!%p216_p9), %v1069_v54, 1  ;;  %vm500_vm11 = vcmp.lt.s32.totalorder (!%p216_p9), %v1069_v54, 127 }
  0x13   : > { %274 = vperm.xlu0 (!%p216_p9), %833, %v263_v2   ;;  %v479_v25 = vrot.slane (!%p216_p9), %v255_v16, %v1017_v12  ;;  %v483_v28 = vrot.slane (!%p216_p9), %v255_v16, %v1019_v15  ;;  %v372_v60 = vrot.slane (!%p216_p9), %v251_v57, %v1017_v12  ;;  %v376_v62 = vrot.slane (!%p216_p9), %v251_v57, %v1019_v15  ;;  %s242_s20 = sand.u32 (!%p216_p9), 1, %s893_s22  }
  0x14   : > { %vm530_vm12 = vcmp.lt.s32.totalorder (!%p216_p9), %v1069_v54, 113  ;;  %vm560_vm13 = vcmp.lt.s32.totalorder (!%p216_p9), %v1069_v54, 112  ;;  %vm590_vm14 = vcmp.lt.s32.totalorder (!%p216_p9), %v1069_v54, 111  ;;  %s765_s26 = sshll.u32 (!%p216_p9), %s242_s20, 3 }
  0x15   : > { %s246_s11 = scalar_select %p245_p10, %s969_s25, 1 }
  0x17   : > { %s782_s14 = sshll.u32 %s246_s11, 3  ;;  %s908_s11 = smov 127  }
  0x18   : > { %s249_s17 = scalar_lea.vmem %s1260_s0, %s782_s14  ;;  %s911_s14 = smov 111  }
  0x19   : > { %v1007_v3 = vld [vmem:[%s249_s17] sm:$0xff] }
  0x1a   : > { %v770_v4 = vcombine.high %v1007_v3, %v1007_v3  ;;  %v769_v5 = vcombine.low %v1007_v3, %v1007_v3 }
  0x1c   : > { %771 = vmatprep.subr.msk.bf16.mxu0 %vm291_vm0, %v770_v4  ;;  %v293_v6 = vsel %vm291_vm0, %v769_v5, 0  ;;  %v402_v4 = vrot.slane %v252_v61, %v1017_v12  ;;  %v406_v5 = vrot.slane %v252_v61, %v1019_v15 }
  0x1d   : > { %299 = vmatpush1.bf16.msra.mxu0 %v293_v6 }
  0x20   : > { %772 = vmatmul.mubr.msk.bf16.vlgmr.msra.gmra.mrb[0].mxu0 %vm287_vm1, %v836_v7 }
  0x8e   : > { %v270_v9 = vpop.permute.xlu0 %269 }
  0x92   : > { %v275_v17 = vpop.permute.xlu0 %274 }
  0xf3   : > { %v332_v11 = vpop.f32.mrb[0].mxu0 }
  0xf4   : > { %v333_v13 = vadd.f32 %v332_v11, %v270_v9  ;;  %v334_v14 = vpop.f32.mrb[1].mxu0 }
  0xf5   : > { %v335_v18 = vadd.f32 %v334_v14, %v270_v9  ;;  %v336_v19 = vpop.f32.mrb[2].mxu0  ;;  %v253_v9 = vld [vmem:[%s1261_s1 + $0x4] sm:$0x3] }
  0xf6   : > { %vm341_vm2 = vcmp.gt.f32.partialorder %v333_v13, 0.0  ;;  %v345_v20 = vmul.f32 0.1, %v333_v13  ;;  %v337_v21 = vadd.f32 %v336_v19, %v275_v17  ;;  %v338_v22 = vpop.f32.mrb[3].mxu0 }
  0xf7   : > { %vm342_vm3 = vcmp.gt.f32.partialorder %v335_v18, 0.0  ;;  %v346_v23 = vmul.f32 0.1, %v335_v18  ;;  %v339_v24 = vadd.f32 %v338_v22, %v275_v17  ;;  %v436_v22 = vrot.slane %v253_v9, %v1019_v15 }
  0xf8   : > { %v349_v26 = vsel %vm341_vm2, %v333_v13, %v345_v20  ;;  %vm343_vm4 = vcmp.gt.f32.partialorder %v337_v21, 0.0  ;;  %v347_v27 = vmul.f32 0.1, %v337_v21 }
  0xf9   : > { %v350_v29 = vsel %vm342_vm3, %v335_v18, %v346_v23  ;;  %vm344_vm5 = vcmp.gt.f32.partialorder %v339_v24, 0.0  ;;  %v348_v30 = vmul.f32 0.1, %v339_v24  ;;  %385 = vrot.lane.b32.xlu0 %v349_v26, %s904_s28  ;;  %353 = vrot.lane.b32.xlu1 %v349_v26, %s905_s29  ;;  %v1028_v33 = vmul.f32 %v479_v25, %v349_v26 }
  0xfa   : > { %v351_v31 = vsel %vm343_vm4, %v337_v21, %v347_v27  ;;  %v1032_v35 = vmul.f32 %v483_v28, %v350_v29  ;;  %v432_v21 = vrot.slane %v253_v9, %v1017_v12  ;;  %v254_v27 = vld [vmem:[%s1261_s1 + $0x6] sm:$0x3] }
  0xfb   : > { %v352_v32 = vsel %vm344_vm5, %v339_v24, %v348_v30  ;;  %v1030_v34 = vmul.f32 %v479_v25, %v351_v31 }
  0xfc   : > { %v1034_v36 = vmul.f32 %v483_v28, %v352_v32 }
  0xfd   : > { %415 = vrot.lane.b32.xlu0 %v349_v26, %s906_s9  ;;  %355 = vrot.lane.b32.xlu1 %v351_v31, %s905_s29  ;;  %v490_v37 = vpack.c.bf16 %v1030_v34, %v1028_v33  ;;  %v259_v34 = vld [vmem:[%s1261_s1 + $0x10] sm:$0x3] }
  0xfe   : > { %v491_v38 = vpack.c.bf16 %v1034_v36, %v1032_v35  ;;  %v258_v35 = vld [vmem:[%s1261_s1 + $0xe] sm:$0x3] }
 0x101   : > { %445 = vrot.lane.b32.xlu0 %v349_v26, %s907_s10  ;;  %387 = vrot.lane.b32.xlu1 %v351_v31, %s904_s28 }
 0x105   : > { %492 = vrot.lane.b32.xlu0 %v349_v26, %s908_s11  ;;  %417 = vrot.lane.b32.xlu1 %v351_v31, %s906_s9 }
 0x109   : > { %522 = vrot.lane.b32.xlu0 %v349_v26, %s909_s12  ;;  %447 = vrot.lane.b32.xlu1 %v351_v31, %s907_s10 }
 0x10d   : > { %552 = vrot.lane.b32.xlu0 %v349_v26, %s910_s13  ;;  %494 = vrot.lane.b32.xlu1 %v351_v31, %s908_s11 }
 0x111   : > { %357 = vrot.lane.b32.xlu0 %v350_v29, %s905_s29  ;;  %524 = vrot.lane.b32.xlu1 %v351_v31, %s909_s12 }
 0x115   : > { %389 = vrot.lane.b32.xlu0 %v350_v29, %s904_s28  ;;  %554 = vrot.lane.b32.xlu1 %v351_v31, %s910_s13 }
 0x119   : > { %419 = vrot.lane.b32.xlu0 %v350_v29, %s906_s9  ;;  %359 = vrot.lane.b32.xlu1 %v352_v32, %s905_s29  ;;  %s244_s29 = scalar_lea.vmem [#allocation2], %s765_s26 }
 0x11d   : > { %449 = vrot.lane.b32.xlu0 %v350_v29, %s907_s10  ;;  %391 = vrot.lane.b32.xlu1 %v352_v32, %s904_s28  ;;  %s784_s28 = sshll.u32 %s969_s25, 7  ;;  %s912_s25 = smov [#allocation2]  }
 0x11e   : > { %s843_s15 = sshll.u32 %s912_s25, 4  ;;  %s844_s15 = int_to_ptr.vmem [resolvable:$false] %s843_s15 }
 0x11f   : > { %s845_s16 = scalar_lea.vmem %s844_s15, 256 }
 0x121   : > { %582 = vrot.lane.b32.xlu0 %v349_v26, %s911_s14  ;;  %421 = vrot.lane.b32.xlu1 %v352_v32, %s906_s9  ;;  %s702_s9 = sshll.u32 %s244_s29, 4  ;;  %s1220_s9 = int_to_ptr.vmem [resolvable:$true] %s702_s9 }
 0x122   : > { %p846_p0 = scmp.lt.s32.totalorder %s1220_s9, %s844_s15 }
 0x125   : > { %496 = vrot.lane.b32.xlu0 %v350_v29, %s908_s11  ;;  %451 = vrot.lane.b32.xlu1 %v352_v32, %s907_s10 }
 0x129   : > { %526 = vrot.lane.b32.xlu0 %v350_v29, %s909_s12  ;;  %584 = vrot.lane.b32.xlu1 %v351_v31, %s911_s14 }
 0x12d   : > { %556 = vrot.lane.b32.xlu0 %v350_v29, %s910_s13  ;;  %498 = vrot.lane.b32.xlu1 %v352_v32, %s908_s11 }
 0x131   : > { %586 = vrot.lane.b32.xlu0 %v350_v29, %s911_s14  ;;  %528 = vrot.lane.b32.xlu1 %v352_v32, %s909_s12  ;;  %s1218_s12 = scalar_lea.hbm %s1266_s6, %s784_s28 }
 0x135   : > { %614 = vperm.xlu0 %833, %v265_v40   ;;  %558 = vrot.lane.b32.xlu1 %v352_v32, %s910_s13  ;;  %s688_s13 = scalar_lea.sflag [#allocation3], %s242_s20 }
 0x139   : > { %588 = vrot.lane.b32.xlu1 %v352_v32, %s911_s14  ;;  %s839_s14 = scalar_lea.vmem %s1220_s9, 128 }
 0x13a   : > { %p840_p11 = scmp.ne.s32.totalorder %s1220_s9, %s839_s14  ;;  %p847_p1 = scmp.lt.s32.totalorder %s845_s16, %s839_s14 }
 0x13c   : > { %p841_p12 = pnand %p840_p11, %p986_p5  ;;  %p848_p2 = por %p847_p1, %p846_p0 }
 0x13e   : > { %p842_p13 = pneg %p841_p12 }
 0x140   : > { %p849_p3 = pnand %p848_p2, %p842_p13 }
 0x16b   : > { %v386_v42 = vpop.permute.xlu0 %385  ;;  %v354_v43 = vpop.permute.xlu1 %353 }
 0x16f   : > { %v416_v44 = vpop.permute.xlu0 %415  ;;  %v356_v45 = vpop.permute.xlu1 %355 }
 0x173   : > { %v1056_v46 = vpop.permute.xlu0 %445  ;;  %v388_v47 = vpop.permute.xlu1 %387 }
 0x177   : > { %v1058_v48 = vpop.permute.xlu0 %492  ;;  %v418_v49 = vpop.permute.xlu1 %417 }
 0x17b   : > { %v1060_v50 = vpop.permute.xlu0 %522  ;;  %v1062_v51 = vpop.permute.xlu1 %447 }
 0x17f   : > { %v1064_v52 = vpop.permute.xlu0 %552  ;;  %v1066_v53 = vpop.permute.xlu1 %494 }
 0x183   : > { %v358_v55 = vpop.permute.xlu0 %357  ;;  %v1071_v56 = vpop.permute.xlu1 %524 }
 0x184   : > { %v364_v63 = vsel %vm363_vm7, %v354_v43, %v358_v55  ;;  %v366_v0 = vsel %vm363_vm7, %v358_v55, %v354_v43  ;;  %v462_v43 = vrot.slane %v254_v27, %v1017_v12 }
 0x185   : > { %v379_v8 = vmul.f32 %v372_v60, %v366_v0  ;;  %v380_v11 = vmul.f32 %v376_v62, %v364_v63 }
 0x187   : > { %v390_v58 = vpop.permute.xlu0 %389  ;;  %v1077_v59 = vpop.permute.xlu1 %554 }
 0x188   : > { %v394_v14 = vsel %vm393_vm8, %v386_v42, %v390_v58  ;;  %v396_v16 = vsel %vm393_vm8, %v390_v58, %v386_v42 }
 0x189   : > { %v409_v25 = vmul.f32 %v402_v4, %v396_v16  ;;  %v410_v26 = vmul.f32 %v406_v5, %v394_v14  ;;  %v257_v16 = vld [vmem:[%s1261_s1 + $0xc] sm:$0x3] }
 0x18b   : > { %v420_v1 = vpop.permute.xlu0 %419  ;;  %v360_v2 = vpop.permute.xlu1 %359 }
 0x18c   : > { %v365_v6 = vsel %vm363_vm7, %v356_v45, %v360_v2  ;;  %v367_v7 = vsel %vm363_vm7, %v360_v2, %v356_v45  ;;  %v424_v30 = vsel %vm423_vm9, %v416_v44, %v420_v1  ;;  %v426_v31 = vsel %vm423_vm9, %v420_v1, %v416_v44 }
 0x18d   : > { %v381_v10 = vmul.f32 %v372_v60, %v367_v7  ;;  %v382_v13 = vmul.f32 %v376_v62, %v365_v6  ;;  %v466_v45 = vrot.slane %v254_v27, %v1019_v15  ;;  %v439_v57 = vmul.f32 %v432_v21, %v426_v31 }
 0x18e   : > { %v440_v44 = vmul.f32 %v436_v22, %v424_v30  ;;  %v569_v30 = vrot.slane %v258_v35, %v1017_v12  ;;  %v573_v31 = vrot.slane %v258_v35, %v1019_v15 }
 0x18f   : > { %v450_v17 = vpop.permute.xlu0 %449  ;;  %v392_v18 = vpop.permute.xlu1 %391  ;;  %v384_v19 = vpack.c.bf16 %v382_v13, %v380_v11  ;;  %v383_v20 = vpack.c.bf16 %v381_v10, %v379_v8 }
 0x190   : > { %v395_v23 = vsel %vm393_vm8, %v388_v47, %v392_v18  ;;  %v397_v24 = vsel %vm393_vm8, %v392_v18, %v388_v47  ;;  %v454_v61 = vsel %vm453_vm10, %v1056_v46, %v450_v17  ;;  %v456_v62 = vsel %vm453_vm10, %v450_v17, %v1056_v46  ;;  %v256_v46 = vld [vmem:[%s1261_s1 + $0xa] sm:$0x3] }
 0x191   : > { %v411_v28 = vmul.f32 %v402_v4, %v397_v24  ;;  %v412_v29 = vmul.f32 %v406_v5, %v395_v23  ;;  %627 = vmatprep.subr.bf16.mxu1 %v384_v19  ;;  %v469_v5 = vmul.f32 %v462_v43, %v456_v62  ;;  %v470_v6 = vmul.f32 %v466_v45, %v454_v61 }
 0x192   : > { %628 = vmatpush1.bf16.msra.mxu1 %v383_v20  ;;  %v509_v14 = vrot.slane %v256_v46, %v1017_v12  ;;  %v539_v20 = vrot.slane %v257_v16, %v1017_v12 }
 0x193   : > { %v1109_v32 = vpop.permute.xlu0 %582  ;;  %v422_v40 = vpop.permute.xlu1 %421  ;;  %v414_v41 = vpack.c.bf16 %v412_v29, %v410_v26  ;;  %v413_v42 = vpack.c.bf16 %v411_v28, %v409_v25 }
 0x194   : > { %v425_v47 = vsel %vm423_vm9, %v418_v49, %v422_v40  ;;  %v427_v55 = vsel %vm423_vm9, %v422_v40, %v418_v49 }
 0x195   : > { %v441_v58 = vmul.f32 %v432_v21, %v427_v55  ;;  %v442_v60 = vmul.f32 %v436_v22, %v425_v47  ;;  %629 = vmatprep.subr.bf16.mxu1 %v414_v41  ;;  %v543_v21 = vrot.slane %v257_v16, %v1019_v15 }
 0x196   : > { %630 = vmatpush1.bf16.msra.mxu1 %v413_v42 }
 0x197   : > { %v497_v63 = vpop.permute.xlu0 %496  ;;  %v452_v0 = vpop.permute.xlu1 %451  ;;  %v444_v1 = vpack.c.bf16 %v442_v60, %v440_v44  ;;  %v443_v2 = vpack.c.bf16 %v441_v58, %v439_v57  ;;  %v599_v44 = vrot.slane %v259_v34, %v1017_v12  ;;  %v603_v58 = vrot.slane %v259_v34, %v1019_v15 }
 0x198   : > { %v455_v49 = vsel %vm453_vm10, %v1062_v51, %v452_v0  ;;  %v457_v4 = vsel %vm453_vm10, %v452_v0, %v1062_v51  ;;  %v513_v51 = vrot.slane %v256_v46, %v1019_v15  ;;  %v501_v17 = vsel %vm500_vm11, %v1058_v48, %v497_v63 }
 0x199   : > { %v471_v7 = vmul.f32 %v462_v43, %v457_v4  ;;  %v472_v8 = vmul.f32 %v466_v45, %v455_v49  ;;  %631 = vmatprep.subr.bf16.mxu1 %v444_v1  ;;  %v503_v18 = vsel %vm500_vm11, %v497_v63, %v1058_v48  ;;  %v516_v23 = vmul.f32 %v509_v14, %v501_v17 }
 0x19a   : > { %632 = vmatpush1.bf16.msra.mxu1 %v443_v2  ;;  %v517_v24 = vmul.f32 %v513_v51, %v503_v18  ;;  %v675_v18 = vunpack.c.h.bf16 %v1007_v3 }
 0x19b   : > { %v527_v9 = vpop.permute.xlu0 %526  ;;  %v1133_v10 = vpop.permute.xlu1 %584  ;;  %v474_v11 = vpack.c.bf16 %v472_v8, %v470_v6  ;;  %v473_v13 = vpack.c.bf16 %v471_v7, %v469_v5 }
 0x19c   : > { %v531_v26 = vsel %vm530_vm12, %v1060_v50, %v527_v9  ;;  %v533_v27 = vsel %vm530_vm12, %v527_v9, %v1060_v50  ;;  %v773_v9 = vcombine.low %v1049_v39, %v1049_v39 }
 0x19d   : > { %633 = vmatprep.subr.bf16.mxu1 %v474_v11  ;;  %v546_v41 = vmul.f32 %v539_v20, %v531_v26  ;;  %v547_v33 = vmul.f32 %v543_v21, %v533_v27 }
 0x19e   : > { %634 = vmatpush1.bf16.msra.mxu1 %v473_v13 }
 0x19f   : > { %635 = vmatprep.subr.bf16.mxu1 %v491_v38  ;;  %v499_v19 = vpop.permute.xlu1 %498  ;;  %v557_v36 = vpop.permute.xlu0 %556 }
 0x1a0   : > { %v502_v22 = vsel %vm500_vm11, %v1066_v53, %v499_v19  ;;  %v504_v48 = vsel %vm500_vm11, %v499_v19, %v1066_v53  ;;  %v561_v43 = vsel %vm560_vm13, %v1064_v52, %v557_v36  ;;  %v563_v45 = vsel %vm560_vm13, %v557_v36, %v1064_v52 }
 0x1a1   : > { %v518_v38 = vmul.f32 %v509_v14, %v502_v22  ;;  %v519_v25 = vmul.f32 %v513_v51, %v504_v48  ;;  %v576_v52 = vmul.f32 %v569_v30, %v561_v43  ;;  %v577_v62 = vmul.f32 %v573_v31, %v563_v45 }
 0x1a2   : > { %636 = vmatpush1.bf16.msra.mxu1 %v490_v37  ;;  %v674_v14 = vunpack.c.l.bf16 %v1007_v3 }
 0x1a3   : > { %v529_v53 = vpop.permute.xlu1 %528  ;;  %v521_v28 = vpack.c.bf16 %v519_v25, %v517_v24  ;;  %v520_v29 = vpack.c.bf16 %v518_v38, %v516_v23 }
 0x1a4   : > { %v532_v40 = vsel %vm530_vm12, %v1071_v56, %v529_v53  ;;  %v534_v50 = vsel %vm530_vm12, %v529_v53, %v1071_v56  ;;  %v587_v56 = vpop.permute.xlu0 %586 }
 0x1a5   : > { %v548_v37 = vmul.f32 %v539_v20, %v532_v40  ;;  %v549_v42 = vmul.f32 %v543_v21, %v534_v50  ;;  %637 = vmatprep.subr.bf16.mxu1 %v521_v28  ;;  %v591_v1 = vsel %vm590_vm14, %v1109_v32, %v587_v56  ;;  %v593_v12 = vsel %vm590_vm14, %v587_v56, %v1109_v32 }
 0x1a6   : > { %638 = vmatpush1.bf16.msra.mxu1 %v520_v29  ;;  %v606_v5 = vmul.f32 %v599_v44, %v591_v1  ;;  %v607_v6 = vmul.f32 %v603_v58, %v593_v12 }
 0x1a7   : > { %v559_v47 = vpop.permute.xlu1 %558  ;;  %v551_v55 = vpack.c.bf16 %v549_v42, %v547_v33  ;;  %v550_v57 = vpack.c.bf16 %v548_v37, %v546_v41 }
 0x1a8   : > { %v562_v60 = vsel %vm560_vm13, %v1077_v59, %v559_v47  ;;  %v564_v61 = vsel %vm560_vm13, %v559_v47, %v1077_v59 }
 0x1a9   : > { %v578_v63 = vmul.f32 %v569_v30, %v562_v60  ;;  %v579_v0 = vmul.f32 %v573_v31, %v564_v61  ;;  %639 = vmatprep.subr.bf16.mxu1 %v551_v55 }
 0x1aa   : > { %640 = vmatpush1.bf16.msra.mxu1 %v550_v57 }
 0x1ab   : > { %v589_v15 = vpop.permute.xlu1 %588  ;;  %v581_v2 = vpack.c.bf16 %v579_v0, %v577_v62  ;;  %v580_v49 = vpack.c.bf16 %v578_v63, %v576_v52 }
 0x1ac   : > { %v592_v59 = vsel %vm590_vm14, %v1133_v10, %v589_v15  ;;  %v594_v4 = vsel %vm590_vm14, %v589_v15, %v1133_v10 }
 0x1ad   : > { %v608_v7 = vmul.f32 %v599_v44, %v592_v59  ;;  %v609_v8 = vmul.f32 %v603_v58, %v594_v4  ;;  %641 = vmatprep.subr.bf16.mxu1 %v581_v2 }
 0x1ae   : > { %642 = vmatpush1.bf16.msra.mxu1 %v580_v49 }
 0x1af   : > { %v611_v32 = vpack.c.bf16 %v609_v8, %v607_v6  ;;  %v610_v46 = vpack.c.bf16 %v608_v7, %v606_v5 }
 0x1b1   : > { %643 = vmatprep.subr.bf16.mxu1 %v611_v32 }
 0x1b2   : > { %644 = vmatpush1.bf16.msra.mxu1 %v610_v46 }
 0x1b4   : > { %v615_v11 = vpop.permute.xlu0 %614 }
 0x1b5   : > { %660 = vmatmul.mubr.bf16.vlgmr.msra.gmra.mrb[0].mxu1 %v773_v9 }
 0x288   : > { %v661_v13 = vpop.f32.mrb[0].mxu1 }
 0x289   : > { %v662_v54 = vadd.f32 %v661_v13, %v615_v11  ;;  %v663_v10 = vpop.f32.mrb[1].mxu1 }
 0x28a   : > { %v664_v51 = vadd.f32 %v663_v10, %v615_v11  ;;  %v665_v16 = vpop.f32.mrb[2].mxu1 }
 0x28b   : > { %vm668_vm15 = vcmp.gt.f32.partialorder %v662_v54, 0.0  ;;  %v670_v17 = vmul.f32 0.1, %v662_v54  ;;  %v666_v19 = vpop.f32.mrb[3].mxu1 }
 0x28c   : > { %vm669_vm0 = vcmp.gt.f32.partialorder %v664_v51, 0.0  ;;  %v671_v39 = vmul.f32 0.1, %v664_v51 }
 0x28d   : > { %v672_v20 = vsel %vm668_vm15, %v662_v54, %v670_v17 }
 0x28e   : > { %v676_v21 = vadd.f32 %v674_v14, %v672_v20  ;;  %v673_v22 = vsel %vm669_vm0, %v664_v51, %v671_v39 }
 0x28f   : > { %v677_v48 = vadd.f32 %v675_v18, %v673_v22 }
 0x291   : > { %v783_v23 = vpack.c.bf16 %v677_v48, %v676_v21 }
 0x293   : > { %686 = vst [vmem:[%s244_s29] sm:$0xff] %v783_v23 }
 0x294   : > { %852 = shalt.err (!%p849_p3)
}
 0x295   : > { %s853_s17 = scalar_lea.hbm %s1218_s12, 128  ;;  %s857_s20 = scalar_lea.hbm %s1266_s6, 256 }
 0x296   : > { %p854_p4 = scmp.ne.s32.totalorder %s1218_s12, %s853_s17  ;;  %p858_p9 = scmp.lt.u32.totalorder %s1218_s12, %s1266_s6 }
 0x297   : > { %p859_p10 = scmp.lt.u32.totalorder %s857_s20, %s853_s17  ;;  %p861_p12 = scmp.lt.u32.totalorder %s853_s17, %s1218_s12 }
 0x298   : > { %p855_p7 = pnand %p854_p4, %p986_p5 }
 0x299   : > { %p860_p11 = por %p859_p10, %p858_p9 }
 0x29a   : > { %p856_p8 = pneg %p855_p7 }
 0x29b   : > { %p862_p13 = por %p861_p12, %p860_p11 }
 0x29d   : > { %p863_p0 = pnand %p862_p13, %p856_p8 }
 0x29f   : > { %866 = shalt.err (!%p863_p0)
}
 0x2a0   : > { %785 = dma.vmem_to_hbm [thread:$0]  (%p986_p5), %s1220_s9, 128, %s1218_s12, %s688_s13  }
 0x2a1 PF: > { %p791_p1 = scmp.ge.s32.totalorder %s901_s24, 2  ;;  %s714_s29 = sand.u32 1, %s889_s21  }
 0x2a2   : > { %s715_s10 = scalar_lea.sflag [#allocation3], %s714_s29 }
 0x2a3   : > { %p788_p2 = pnand %p791_p1, %p990_p6 }
 0x2a5   : > { %884 = dma.done.wait (!%p788_p2), %s715_s10, 128  }
 0x2a6   : > { %886 = vsyncadd (!%p788_p2), %s715_s10, 4294967168  ;;  %p16_p3 = scmp.ge.s32.totalorder %s973_s27, 4   ;;  %s1269_s21 = smov %s893_s22 }
 0x2a7   : > { %s1270_s22 = smov %s897_s23  ;;  %s1271_s23 = smov %s984_s30 }
 0x2a8   : > { %s1272_s24 = smov %s973_s27  ;;  %18 = sbr.rel (!%p16_p3) target bundleno = 3 (0x3), region = 79 }
 0x2af   :  { %720 = vsyncpa [#allocation3], 1 }
 0x2b0   :  { %722 = vsyncpa [#allocation3 + $0x1], 1 }

</bundles_post_ra>
